<compile_context>
chip_gen: v7x
topology: tpu7x:2x2x1
jax: 0.10.0
libtpu: 0.0.40
codegen_flags: <defaults>
</compile_context>

<pallas_src>
import functools
import math

import jax
import jax.numpy as jnp
from jax.experimental import pallas as pl
from jax.experimental.pallas import tpu as pltpu

HIDDEN = 64
LANE = 128
SUBLANE = 8


def _round_up(x, m):
    return ((x + m - 1) // m) * m


# --------------------------------------------------------------------------
# Kernel
# --------------------------------------------------------------------------
def _gaussian_pi_kernel(obs_ref, act_ref, w_ref, b_ref, out_ref,
                        *, dp, hp, ap, act_dim):
    obs = obs_ref[...]                       # (TB, dp)  lane-padded obs
    bsl = b_ref[...]                         # (8, pw)   packed bias/log-std rows

    # Static slices of the VMEM-resident weight slab (row offsets are
    # multiples of 128, so they are tile-aligned views).
    w1 = w_ref[0:dp, 0:hp]                   # (dp, hp)
    w2 = w_ref[dp:dp + hp, 0:hp]             # (hp, hp)
    w3 = w_ref[dp + hp:dp + 2 * hp, 0:ap]    # (hp, ap)

    # ----- MLP: Linear -> tanh -> Linear -> tanh -> Linear -----
    h1 = jnp.tanh(jnp.dot(obs, w1, preferred_element_type=jnp.float32)
                  + bsl[0:1, 0:hp])          # (TB, hp), pad lanes stay 0
    h2 = jnp.tanh(jnp.dot(h1, w2, preferred_element_type=jnp.float32)
                  + bsl[1:2, 0:hp])          # (TB, hp)
    mu = (jnp.dot(h2, w3, preferred_element_type=jnp.float32)
          + bsl[2:3, 0:ap])                  # (TB, ap); pad lanes exactly 0

    # ----- Normal(mu, std).log_prob(actions).sum(-1) -----
    inv_std = bsl[3:4, 0:ap]                 # exp(-log_std); 0 in pad lanes
    lconst = bsl[4:5, 0:ap]                  # -log_std - 0.5*log(2pi); 0 in pad

    z = (act_ref[...] - mu) * inv_std        # pad lanes -> 0
    logp = jnp.sum(-0.5 * (z * z) + lconst, axis=-1, keepdims=True)  # (TB, 1)

    # Fold logp into spare lane `act_dim` of the padded mu slab (lane-dense
    # single output store).
    lane = jax.lax.broadcasted_iota(jnp.int32, mu.shape, 1)
    out_ref[...] = jnp.where(lane == act_dim, logp, mu)


# --------------------------------------------------------------------------
# Parameter packing (done once per parameter set, not on the hot path)
# --------------------------------------------------------------------------
def pack_params(params, obs_dim, act_dim):
    """Pack the 7 small parameter tensors into two 128-lane slabs."""
    w1, b1, w2, b2, w3, b3, log_std = params

    dp = _round_up(obs_dim, LANE)            # padded obs / w1-row dim
    hp = _round_up(HIDDEN, LANE)             # padded hidden dim (128)
    ap = _round_up(act_dim + 1, LANE)        # padded act dim, +1 spare lane
    pw = max(hp, ap)                         # slab lane width

    w_slab = jnp.zeros((dp + 2 * hp, pw), jnp.float32)
    w_slab = w_slab.at[:obs_dim, :HIDDEN].set(w1)
    w_slab = w_slab.at[dp:dp + HIDDEN, :HIDDEN].set(w2)
    w_slab = w_slab.at[dp + hp:dp + hp + HIDDEN, :act_dim].set(w3)

    ls = jnp.reshape(log_std, (-1,)).astype(jnp.float32)        # (act_dim,)
    b_slab = jnp.zeros((SUBLANE, pw), jnp.float32)
    b_slab = b_slab.at[0, :HIDDEN].set(jnp.reshape(b1, (-1,)))
    b_slab = b_slab.at[1, :HIDDEN].set(jnp.reshape(b2, (-1,)))
    b_slab = b_slab.at[2, :act_dim].set(jnp.reshape(b3, (-1,)))
    b_slab = b_slab.at[3, :act_dim].set(jnp.exp(-ls))            # 1/std
    b_slab = b_slab.at[4, :act_dim].set(-ls - 0.5 * math.log(2.0 * math.pi))

    std = jnp.exp(ls)                        # returned for the Normal "pi"
    dims = (obs_dim, act_dim, dp, hp, ap, pw)
    return (w_slab, b_slab, std, dims)


# --------------------------------------------------------------------------
# Forward wrapper
# --------------------------------------------------------------------------
def gaussian_pi_forward(obs, actions, packed):
    """Returns ((mu, std), logp_a) — mirrors PyTorch (pi, logp_a)."""
    w_slab, b_slab, std, dims = packed
    obs_dim, act_dim, dp, hp, ap, pw = dims
    B = obs.shape[0]

    # Batch tile: large when B is large (amortizes per-step overhead, lets
    # the pipeline overlap DMA and compute); shrink to the batch when small.
    # TB=512 f32 tiles keep the double-buffered working set ~2 MiB — safe on
    # v5e/v6e (128 MiB VMEM) and v7x (64 MiB).
    TB = 512
    if B < TB:
        TB = _round_up(B, SUBLANE)
    Bp = _round_up(B, TB)

    obs_p = jnp.pad(obs.astype(jnp.float32),
                    ((0, Bp - B), (0, dp - obs_dim)))
    act_p = jnp.pad(actions.astype(jnp.float32),
                    ((0, Bp - B), (0, ap - act_dim)))

    kernel = functools.partial(_gaussian_pi_kernel,
                               dp=dp, hp=hp, ap=ap, act_dim=act_dim)

    out = pl.pallas_call(
        kernel,
        out_shape=jax.ShapeDtypeStruct((Bp, ap), jnp.float32),
        grid=(Bp // TB,),
        in_specs=[
            pl.BlockSpec((TB, dp), lambda i: (i, 0)),            # obs tile
            pl.BlockSpec((TB, ap), lambda i: (i, 0)),            # actions tile
            pl.BlockSpec((dp + 2 * hp, pw), lambda i: (0, 0)),   # weight slab
            pl.BlockSpec((SUBLANE, pw), lambda i: (0, 0)),       # bias slab
        ],
        out_specs=pl.BlockSpec((TB, ap), lambda i: (i, 0)),
        compiler_params=pltpu.CompilerParams(
            dimension_semantics=("parallel",)),                  # v7x dual-TC
    )(obs_p, act_p, w_slab, b_slab)

    mu = out[:B, :act_dim]
    logp = out[:B, act_dim]
    # The torch.distributions.Normal object is represented by (mu, std).
    return (mu, std), logp


# --------------------------------------------------------------------------
# Parameters / reference
# --------------------------------------------------------------------------
def init_params(key, obs_dim, act_dim):
    """Deterministic synthetic parameters matching the PyTorch shapes."""
    ks = jax.random.split(key, 6)
    scale1 = 1.0 / math.sqrt(obs_dim)
    scale2 = 1.0 / math.sqrt(HIDDEN)
    w1 = jax.random.uniform(ks[0], (obs_dim, HIDDEN), jnp.float32, -scale1, scale1)
    b1 = jax.random.uniform(ks[1], (HIDDEN,), jnp.float32, -scale1, scale1)
    w2 = jax.random.uniform(ks[2], (HIDDEN, HIDDEN), jnp.float32, -scale2, scale2)
    b2 = jax.random.uniform(ks[3], (HIDDEN,), jnp.float32, -scale2, scale2)
    w3 = jax.random.uniform(ks[4], (HIDDEN, act_dim), jnp.float32, -scale2, scale2)
    b3 = jax.random.uniform(ks[5], (act_dim,), jnp.float32, -scale2, scale2)
    log_std = jnp.full((act_dim,), -0.5, dtype=jnp.float32)
    return (w1, b1, w2, b2, w3, b3, log_std)


def _reference(obs, actions, params):
    w1, b1, w2, b2, w3, b3, log_std = params
    h1 = jnp.tanh(obs @ w1 + b1)
    h2 = jnp.tanh(h1 @ w2 + b2)
    mu = h2 @ w3 + b3
    logp = (-0.5 * ((actions - mu) * jnp.exp(-log_std)) ** 2
            - log_std - 0.5 * math.log(2.0 * math.pi)).sum(-1)
    return mu, logp


if __name__ == "__main__":
    B, obs_dim, act_dim = 8, 32, 8

    key = jax.random.PRNGKey(0)
    k_obs, k_act, k_par = jax.random.split(key, 3)
    obs = jax.random.normal(k_obs, (B, obs_dim), jnp.float32)
    actions = jax.random.normal(k_act, (B, act_dim), jnp.float32)
    params = init_params(k_par, obs_dim, act_dim)

    packed = pack_params(params, obs_dim, act_dim)
    (mu, std), logp = gaussian_pi_forward(obs, actions, packed)
    jax.block_until_ready((mu, std, logp))

    mu_ref, logp_ref = _reference(obs, actions, params)
    std_ref = jnp.exp(params[-1])
    assert mu.shape == (B, act_dim) and logp.shape == (B,)
    assert jnp.allclose(mu, mu_ref, atol=1e-5, rtol=1e-5)
    assert jnp.allclose(logp, logp_ref, atol=1e-4, rtol=1e-4)
    assert jnp.allclose(std, std_ref, atol=1e-6, rtol=1e-6)

    print("KERNEL_OK")
</pallas_src>

<mosaic_0001>
module attributes {stable_mosaic.version = 11 : i64} {
  func.func @_gaussian_pi_kernel(%arg0: i32, %arg1: memref<8x128xf32, #tpu.memory_space<vmem>>, %arg2: memref<8x128xf32, #tpu.memory_space<vmem>>, %arg3: memref<384x128xf32, #tpu.memory_space<vmem>>, %arg4: memref<8x128xf32, #tpu.memory_space<vmem>>, %arg5: memref<8x128xf32, #tpu.memory_space<vmem>>) attributes {dimension_semantics = [#tpu.dimension_semantics<parallel>], iteration_bounds = array<i64: 1>, scalar_prefetch = 0 : i64, scratch_operands = 0 : i64, tpu.core_type = #tpu.core_type<tc>, window_params = [{transform_indices = @transform_0, window_bounds = array<i64: 8, 128>}, {transform_indices = @transform_1, window_bounds = array<i64: 8, 128>}, {pipeline_mode = #tpu.pipeline_mode<synchronous>, transform_indices = @transform_2, window_bounds = array<i64: 384, 128>}, {pipeline_mode = #tpu.pipeline_mode<synchronous>, transform_indices = @transform_3, window_bounds = array<i64: 8, 128>}, {transform_indices = @transform_4, window_bounds = array<i64: 8, 128>}]} {
    %c0 = arith.constant 0 : index
    %c0_0 = arith.constant 0 : index
    %0 = vector.load %arg1[%c0, %c0_0] : memref<8x128xf32, #tpu.memory_space<vmem>>, vector<8x128xf32>
    %c0_1 = arith.constant 0 : index
    %c0_2 = arith.constant 0 : index
    %1 = vector.load %arg4[%c0_1, %c0_2] : memref<8x128xf32, #tpu.memory_space<vmem>>, vector<8x128xf32>
    %c0_3 = arith.constant 0 : index
    %c0_4 = arith.constant 0 : index
    %2 = vector.load %arg3[%c0_3, %c0_4] : memref<384x128xf32, #tpu.memory_space<vmem>>, vector<128x128xf32>
    %c128 = arith.constant 128 : index
    %c0_5 = arith.constant 0 : index
    %3 = vector.load %arg3[%c128, %c0_5] : memref<384x128xf32, #tpu.memory_space<vmem>>, vector<128x128xf32>
    %c256 = arith.constant 256 : index
    %c0_6 = arith.constant 0 : index
    %4 = vector.load %arg3[%c256, %c0_6] : memref<384x128xf32, #tpu.memory_space<vmem>>, vector<128x128xf32>
    %cst = arith.constant dense<0.000000e+00> : vector<8x128xf32>
    %5 = tpu.matmul %0, %2, %cst {dimension_numbers = #tpu.dot_dimension_numbers<[1], [0], [0], [1], [0, 0, 1, 1], [], []>} : vector<8x128xf32>, vector<128x128xf32>, vector<8x128xf32> -> vector<8x128xf32>
    %6 = vector.extract_strided_slice %1 {offsets = [0, 0], sizes = [1, 128], strides = [1, 1]} : vector<8x128xf32> to vector<1x128xf32>
    %7 = vector.broadcast %6 : vector<1x128xf32> to vector<8x128xf32>
    %8 = arith.addf %5, %7 : vector<8x128xf32>
    %9 = math.tanh %8 : vector<8x128xf32>
    %cst_7 = arith.constant dense<0.000000e+00> : vector<8x128xf32>
    %10 = tpu.matmul %9, %3, %cst_7 {dimension_numbers = #tpu.dot_dimension_numbers<[1], [0], [0], [1], [0, 0, 1, 1], [], []>} : vector<8x128xf32>, vector<128x128xf32>, vector<8x128xf32> -> vector<8x128xf32>
    %11 = vector.extract_strided_slice %1 {offsets = [1, 0], sizes = [1, 128], strides = [1, 1]} : vector<8x128xf32> to vector<1x128xf32>
    %12 = vector.broadcast %11 : vector<1x128xf32> to vector<8x128xf32>
    %13 = arith.addf %10, %12 : vector<8x128xf32>
    %14 = math.tanh %13 : vector<8x128xf32>
    %cst_8 = arith.constant dense<0.000000e+00> : vector<8x128xf32>
    %15 = tpu.matmul %14, %4, %cst_8 {dimension_numbers = #tpu.dot_dimension_numbers<[1], [0], [0], [1], [0, 0, 1, 1], [], []>} : vector<8x128xf32>, vector<128x128xf32>, vector<8x128xf32> -> vector<8x128xf32>
    %16 = vector.extract_strided_slice %1 {offsets = [2, 0], sizes = [1, 128], strides = [1, 1]} : vector<8x128xf32> to vector<1x128xf32>
    %17 = vector.broadcast %16 : vector<1x128xf32> to vector<8x128xf32>
    %18 = arith.addf %15, %17 : vector<8x128xf32>
    %19 = vector.extract_strided_slice %1 {offsets = [3, 0], sizes = [1, 128], strides = [1, 1]} : vector<8x128xf32> to vector<1x128xf32>
    %20 = vector.extract_strided_slice %1 {offsets = [4, 0], sizes = [1, 128], strides = [1, 1]} : vector<8x128xf32> to vector<1x128xf32>
    %c0_9 = arith.constant 0 : index
    %c0_10 = arith.constant 0 : index
    %21 = vector.load %arg2[%c0_9, %c0_10] : memref<8x128xf32, #tpu.memory_space<vmem>>, vector<8x128xf32>
    %22 = arith.subf %21, %18 : vector<8x128xf32>
    %23 = vector.broadcast %19 : vector<1x128xf32> to vector<8x128xf32>
    %24 = arith.mulf %22, %23 : vector<8x128xf32>
    %25 = arith.mulf %24, %24 : vector<8x128xf32>
    %cst_11 = arith.constant -5.000000e-01 : f32
    %26 = vector.broadcast %cst_11 : f32 to vector<8x128xf32>
    %27 = arith.mulf %26, %25 : vector<8x128xf32>
    %28 = vector.broadcast %20 : vector<1x128xf32> to vector<8x128xf32>
    %29 = arith.addf %27, %28 : vector<8x128xf32>
    %cst_12 = arith.constant dense<0.000000e+00> : vector<8xf32>
    %30 = vector.multi_reduction <add>, %29, %cst_12 [1] : vector<8x128xf32> to vector<8xf32>
    %31 = vector.shape_cast %30 : vector<8xf32> to vector<8x1xf32>
    %32 = tpu.iota {dimensions = array<i32: 1>} : vector<8x128xi32>
    %c8_i32 = arith.constant 8 : i32
    %33 = vector.broadcast %c8_i32 : i32 to vector<8x128xi32>
    %34 = arith.cmpi eq, %32, %33 : vector<8x128xi32>
    %35 = vector.shape_cast %31 : vector<8x1xf32> to vector<8x1xf32>
    %36 = vector.broadcast %35 : vector<8x1xf32> to vector<8x128xf32>
    %37 = arith.select %34, %36, %18 : vector<8x128xi1>, vector<8x128xf32>
    %c0_13 = arith.constant 0 : index
    %c0_14 = arith.constant 0 : index
    %38 = vector.load %arg5[%c0_13, %c0_14] : memref<8x128xf32, #tpu.memory_space<vmem>>, vector<8x128xf32>
    tpu.vector_store %arg5[%c0_13, %c0_14], %37 {strides = array<i32>} : memref<8x128xf32, #tpu.memory_space<vmem>>, vector<8x128xf32>,
    return
  }
  func.func @transform_0(%arg0: i32) -> (i32, i32) {
    %c0_i32 = arith.constant 0 : i32
    %c0_i32_0 = arith.constant 0 : i32
    return %arg0, %c0_i32 : i32, i32
  }
  func.func @transform_1(%arg0: i32) -> (i32, i32) {
    %c0_i32 = arith.constant 0 : i32
    %c0_i32_0 = arith.constant 0 : i32
    return %arg0, %c0_i32 : i32, i32
  }
  func.func @transform_2(%arg0: i32) -> (i32, i32) {
    %c0_i32 = arith.constant 0 : i32
    %c0_i32_0 = arith.constant 0 : i32
    %c0_i32_1 = arith.constant 0 : i32
    return %c0_i32, %c0_i32_0 : i32, i32
  }
  func.func @transform_3(%arg0: i32) -> (i32, i32) {
    %c0_i32 = arith.constant 0 : i32
    %c0_i32_0 = arith.constant 0 : i32
    %c0_i32_1 = arith.constant 0 : i32
    return %c0_i32, %c0_i32_0 : i32, i32
  }
  func.func @transform_4(%arg0: i32) -> (i32, i32) {
    %c0_i32 = arith.constant 0 : i32
    %c0_i32_0 = arith.constant 0 : i32
    return %arg0, %c0_i32 : i32, i32
  }
}

</mosaic_0001>

<bundles_post_ra>
// kernel: tpu_custom_call.1
= control target key start
LH: loop header
LB: loop body
LE: loop exit
PB: predicated region body
PF: predicated region fallthrough
CT: control target
= control target key end

     0   :  { %9 = vsyncpa [#allocation3], 0  ;;  %s816_s0 = inlined_call_operand.hbm [shape: f32[8,128], index: 0, kind: input, shape index: {}]   ;;  %s817_s1 = inlined_call_operand.hbm [shape: f32[8,128], index: 1, kind: input, shape index: {}]   ;;  %s818_s2 = inlined_call_operand.hbm [shape: f32[384,128], index: 2, kind: input, shape index: {}]   ;;  %s819_s3 = inlined_call_operand.vmem [shape: f32[8,128], index: 3, kind: input, shape index: {}]   ;;  %s820_s4 = inlined_call_operand.hbm [shape: f32[8,128], index: 4, kind: output, shape index: {}]  }
   0x1   :  { %10 = vsyncpa [#allocation6], 0 }
   0x2   :  { %11 = vsyncpa [#allocation4], 0  ;;  %s701_s15 = smov [#allocation5]   ;;  %s702_s17 = smov [#allocation2]  }
   0x3   :  { %s28_s16 = sshll.u32 %s701_s15, 4  ;;  %s18_s18 = sshll.u32 %s702_s17, 4  ;;  %s29_s16 = int_to_ptr.vmem [resolvable:$true] %s28_s16  ;;  %s19_s18 = int_to_ptr.vmem [resolvable:$true] %s18_s18 }
   0x4   :  { %s607_s21 = scalar_lea.hbm %s817_s1, 128 }
   0x5   :  { %p608_p0 = scmp.ne.s32.totalorder %s817_s1, %s607_s21  ;;  %p611_p1 = scmp.lt.u32.totalorder %s607_s21, %s817_s1 }
   0x7   :  { %p613_p2 = pnand %p611_p1, %p608_p0 }
   0x9   :  { %616 = shalt.err (!%p613_p2)
}
   0xa   :  { %s617_s26 = scalar_lea.vmem %s29_s16, 128  ;;  %p622_p4 = scmp.lt.s32.totalorder %s29_s16, %s29_s16 }
   0xb   :  { %p618_p3 = scmp.ne.s32.totalorder %s29_s16, %s617_s26  ;;  %p623_p5 = scmp.lt.s32.totalorder %s617_s26, %s617_s26 }
   0xd   :  { %p624_p6 = por %p623_p5, %p622_p4 }
   0xf   :  { %p625_p7 = pnand %p624_p6, %p618_p3 }
  0x11   :  { %628 = shalt.err (!%p625_p7)
}
  0x12   :  { %31 = dma.hbm_to_vmem [thread:$0]  %s817_s1, 128, %s29_s16, [#allocation6]  }
  0x13   :  { %s629_s5 = scalar_lea.hbm %s816_s0, 128 }
  0x14   :  { %p630_p8 = scmp.ne.s32.totalorder %s816_s0, %s629_s5  ;;  %p633_p9 = scmp.lt.u32.totalorder %s629_s5, %s816_s0 }
  0x16   :  { %p635_p10 = pnand %p633_p9, %p630_p8 }
  0x18   :  { %638 = shalt.err (!%p635_p10)
}
  0x19   :  { %s639_s10 = scalar_lea.vmem %s19_s18, 128  ;;  %p644_p12 = scmp.lt.s32.totalorder %s19_s18, %s19_s18 }
  0x1a   :  { %p640_p11 = scmp.ne.s32.totalorder %s19_s18, %s639_s10  ;;  %p645_p13 = scmp.lt.s32.totalorder %s639_s10, %s639_s10 }
  0x1c   :  { %p646_p0 = por %p645_p13, %p644_p12 }
  0x1e   :  { %p647_p1 = pnand %p646_p0, %p640_p11 }
  0x20   :  { %650 = shalt.err (!%p647_p1)
}
  0x21   :  { %21 = dma.hbm_to_vmem [thread:$0]  %s816_s0, 128, %s19_s18, [#allocation3]  }
  0x22   :  { %s703_s12 = smov [#allocation7]   ;;  %s651_s16 = scalar_lea.hbm %s818_s2, 6144 }
  0x23   :  { %s37_s13 = sshll.u32 %s703_s12, 4  ;;  %p652_p2 = scmp.ne.s32.totalorder %s818_s2, %s651_s16  ;;  %s38_s13 = int_to_ptr.vmem [resolvable:$true] %s37_s13 }
  0x24   :  { %p655_p3 = scmp.lt.u32.totalorder %s651_s16, %s818_s2 }
  0x26   :  { %p657_p4 = pnand %p655_p3, %p652_p2 }
  0x28   :  { %660 = shalt.err (!%p657_p4)
}
  0x29   :  { %s661_s22 = scalar_lea.vmem %s38_s13, 6144  ;;  %p666_p6 = scmp.lt.s32.totalorder %s38_s13, %s38_s13 }
  0x2a   :  { %p662_p5 = scmp.ne.s32.totalorder %s38_s13, %s661_s22  ;;  %p667_p7 = scmp.lt.s32.totalorder %s661_s22, %s661_s22 }
  0x2c   :  { %p668_p8 = por %p667_p7, %p666_p6 }
  0x2e   :  { %p669_p9 = pnand %p668_p8, %p662_p5 }
  0x30   :  { %672 = shalt.err (!%p669_p9)
}
  0x31   :  { %s704_s0 = smov 128   ;;  %s705_s18 = smov 8  }
  0x32   :  { %43 = dma.hbm_to_vmem [thread:$0]  %s818_s2, 6144, %s38_s13, [#allocation6], %s704_s0, %s704_s0, %s705_s18  }
  0x33   :  { %695 = dma.done.wait [#allocation3], 128  }
  0x34   :  { %696 = vsyncadd [#allocation3], 4294967168 }
  0x35   :  { %697 = dma.done.wait [#allocation6], 6272  }
  0x36   :  { %698 = vsyncadd [#allocation6], 4294961024  ;;  %v706_v0 = vmov 0.0|0.0   ;;  %vm707_vm0 = vmmov 0   ;;  %v708_v1 = vmov 0.0   ;;  %v57_v2 = vld [vmem:[#allocation7] sm:$0xff] }
  0x37   :  { %522 = vmatprep.subr.bf16.mxu0 %v706_v0  ;;  %449 = vmatprep.mubr.msk.f32.mxu0 %vm707_vm0, %v708_v1  ;;  %v58_v3 = vld [vmem:[#allocation7 + $0x8] sm:$0xff]  ;;  %v59_v4 = vld [vmem:[#allocation7 + $0x10] sm:$0xff]  ;;  %v60_v6 = vld [vmem:[#allocation7 + $0x18] sm:$0xff] }
  0x38   :  { %546 = vmatprep.subr.bf16.mxu1 %v706_v0  ;;  %484 = vmatprep.mubr.msk.f32.mxu1 %vm707_vm0, %v708_v1  ;;  %v523_v5 = vpack.c.bf16 %v58_v3, %v57_v2  ;;  %v526_v7 = vpack.c.bf16 %v60_v6, %v59_v4  ;;  %v61_v8 = vld [vmem:[#allocation7 + $0x20] sm:$0xff]  ;;  %v62_v9 = vld [vmem:[#allocation7 + $0x28] sm:$0xff]  ;;  %v75_v12 = vld [vmem:[#allocation7 + $0x90] sm:$0xff]  ;;  %v105_v3 = vlaneseq }
  0x39   :  { %v73_v10 = vld [vmem:[#allocation7 + $0x80] sm:$0xff]  ;;  %v74_v11 = vld [vmem:[#allocation7 + $0x88] sm:$0xff]  ;;  %v76_v13 = vld [vmem:[#allocation7 + $0x98] sm:$0xff]  ;;  %v529_v14 = vpack.c.bf16 %v62_v9, %v61_v8 }
  0x3a   :  { %524 = vmatpush3.bf16.msra.mxu0 %v523_v5  ;;  %v547_v15 = vpack.c.bf16 %v74_v11, %v73_v10  ;;  %v63_v16 = vld [vmem:[#allocation7 + $0x30] sm:$0xff]  ;;  %v64_v17 = vld [vmem:[#allocation7 + $0x38] sm:$0xff]  ;;  %v550_v18 = vpack.c.bf16 %v76_v13, %v75_v12  ;;  %v77_v19 = vld [vmem:[#allocation7 + $0xa0] sm:$0xff]  ;;  %v106_v4 = vshrl.u32 %v105_v3, 7 }
  0x3b   :  { %525 = vmatprep.subr.bf16.mxu0 %v706_v0  ;;  %v78_v20 = vld [vmem:[#allocation7 + $0xa8] sm:$0xff]  ;;  %v532_v21 = vpack.c.bf16 %v64_v17, %v63_v16  ;;  %v65_v22 = vld [vmem:[#allocation7 + $0x40] sm:$0xff]  ;;  %v79_v25 = vld [vmem:[#allocation7 + $0xb0] sm:$0xff] }
  0x3c   :  { %548 = vmatpush3.bf16.msra.mxu1 %v547_v15  ;;  %v66_v23 = vld [vmem:[#allocation7 + $0x48] sm:$0xff]  ;;  %v553_v24 = vpack.c.bf16 %v78_v20, %v77_v19  ;;  %v80_v26 = vld [vmem:[#allocation7 + $0xb8] sm:$0xff]  ;;  %v67_v28 = vld [vmem:[#allocation7 + $0x50] sm:$0xff]  ;;  %v107_v5 = vsub.s32 0, %v106_v4 }
  0x3d   :  { %549 = vmatprep.subr.bf16.mxu1 %v706_v0  ;;  %v535_v27 = vpack.c.bf16 %v66_v23, %v65_v22  ;;  %v68_v29 = vld [vmem:[#allocation7 + $0x58] sm:$0xff]  ;;  %v556_v30 = vpack.c.bf16 %v80_v26, %v79_v25  ;;  %v81_v31 = vld [vmem:[#allocation7 + $0xc0] sm:$0xff]  ;;  %v82_v32 = vld [vmem:[#allocation7 + $0xc8] sm:$0xff] }
  0x3e   :  { %527 = vmatpush3.bf16.msra.mxu0 %v526_v7  ;;  %v538_v33 = vpack.c.bf16 %v68_v29, %v67_v28  ;;  %v69_v34 = vld [vmem:[#allocation7 + $0x60] sm:$0xff]  ;;  %v70_v35 = vld [vmem:[#allocation7 + $0x68] sm:$0xff]  ;;  %v559_v36 = vpack.c.bf16 %v82_v32, %v81_v31  ;;  %v71_v38 = vld [vmem:[#allocation7 + $0x70] sm:$0xff]  ;;  %v333_v29 = vsub.s32 3, %v106_v4 }
  0x3f   :  { %528 = vmatprep.subr.bf16.mxu0 %v706_v0  ;;  %v541_v37 = vpack.c.bf16 %v70_v35, %v69_v34  ;;  %v72_v39 = vld [vmem:[#allocation7 + $0x78] sm:$0xff]  ;;  %v55_v41 = vld [vmem:[#allocation2] sm:$0xff]  ;;  %v85_v45 = vld [vmem:[#allocation7 + $0xe0] sm:$0xff] }
  0x40   :  { %551 = vmatpush3.bf16.msra.mxu1 %v550_v18  ;;  %v544_v40 = vpack.c.bf16 %v72_v39, %v71_v38  ;;  %v83_v42 = vld [vmem:[#allocation7 + $0xd0] sm:$0xff]  ;;  %v84_v43 = vld [vmem:[#allocation7 + $0xd8] sm:$0xff]  ;;  %v86_v46 = vld [vmem:[#allocation7 + $0xe8] sm:$0xff] }
  0x41   :  { %552 = vmatprep.subr.bf16.mxu1 %v706_v0  ;;  %v562_v44 = vpack.c.bf16 %v84_v43, %v83_v42  ;;  %v565_v47 = vpack.c.bf16 %v86_v46, %v85_v45  ;;  %v87_v48 = vld [vmem:[#allocation7 + $0xf0] sm:$0xff]  ;;  %v88_v49 = vld [vmem:[#allocation7 + $0xf8] sm:$0xff]  ;;  %v89_v51 = vld [vmem:[#allocation7 + $0x100] sm:$0xff] }
  0x42   :  { %530 = vmatpush3.bf16.msra.mxu0 %v529_v14  ;;  %v568_v50 = vpack.c.bf16 %v88_v49, %v87_v48  ;;  %v90_v52 = vld [vmem:[#allocation7 + $0x108] sm:$0xff]  ;;  %v91_v53 = vld [vmem:[#allocation7 + $0x110] sm:$0xff]  ;;  %v92_v55 = vld [vmem:[#allocation7 + $0x118] sm:$0xff] }
  0x43   :  { %531 = vmatprep.subr.bf16.mxu0 %v706_v0  ;;  %v571_v54 = vpack.c.bf16 %v90_v52, %v89_v51  ;;  %v574_v56 = vpack.c.bf16 %v92_v55, %v91_v53  ;;  %v93_v57 = vld [vmem:[#allocation7 + $0x120] sm:$0xff]  ;;  %v94_v58 = vld [vmem:[#allocation7 + $0x128] sm:$0xff]  ;;  %v95_v60 = vld [vmem:[#allocation7 + $0x130] sm:$0xff] }
  0x44   :  { %554 = vmatpush3.bf16.msra.mxu1 %v553_v24  ;;  %v577_v59 = vpack.c.bf16 %v94_v58, %v93_v57  ;;  %v96_v61 = vld [vmem:[#allocation7 + $0x138] sm:$0xff]  ;;  %v97_v63 = vld [vmem:[#allocation7 + $0x140] sm:$0xff]  ;;  %v56_v6 = vld [vmem:[%s819_s3] sm:$0xff]  ;;  %s709_s3 = smov [#allocation8]  }
  0x45   :  { %555 = vmatprep.subr.bf16.mxu1 %v706_v0  ;;  %v580_v62 = vpack.c.bf16 %v96_v61, %v95_v60  ;;  %v108_v7 = vrot.slane %v56_v6, %v107_v5  ;;  %v99_v12 = vld [vmem:[#allocation7 + $0x150] sm:$0xff]  ;;  %v100_v13 = vld [vmem:[#allocation7 + $0x158] sm:$0xff]  ;;  %v101_v15 = vld [vmem:[#allocation7 + $0x160] sm:$0xff]  ;;  %v334_v34 = vrot.slane %v56_v6, %v333_v29  ;;  %s356_s26 = sshll.u32 %s709_s3, 4  ;;  %s357_s26 = int_to_ptr.vmem [resolvable:$true] %s356_s26 }
  0x46   :  { %533 = vmatpush3.bf16.msra.mxu0 %v532_v21  ;;  %v586_v14 = vpack.c.bf16 %v100_v13, %v99_v12  ;;  %v102_v16 = vld [vmem:[#allocation7 + $0x168] sm:$0xff]  ;;  %v103_v18 = vld [vmem:[#allocation7 + $0x170] sm:$0xff]  ;;  %v104_v19 = vld [vmem:[#allocation7 + $0x178] sm:$0xff]  ;;  %v182_v21 = vsub.s32 1, %v106_v4  ;;  %s673_s27 = scalar_lea.vmem %s357_s26, 128  ;;  %p678_p11 = scmp.lt.s32.totalorder %s357_s26, %s357_s26 }
  0x47   :  { %534 = vmatprep.subr.bf16.mxu0 %v706_v0  ;;  %v589_v17 = vpack.c.bf16 %v102_v16, %v101_v15  ;;  %v592_v20 = vpack.c.bf16 %v104_v19, %v103_v18  ;;  %v329_v31 = vld [vmem:[#allocation5] sm:$0xff]  ;;  %p674_p10 = scmp.ne.s32.totalorder %s357_s26, %s673_s27  ;;  %p679_p12 = scmp.lt.s32.totalorder %s673_s27, %s673_s27 }
  0x48   :  { %557 = vmatpush3.bf16.msra.mxu1 %v556_v30  ;;  %v183_v22 = vrot.slane %v56_v6, %v182_v21 }
  0x49   :  { %558 = vmatprep.subr.bf16.mxu1 %v706_v0  ;;  %p680_p13 = por %p679_p12, %p678_p11 }
  0x4a   :  { %536 = vmatpush3.bf16.msra.mxu0 %v535_v27  ;;  %v257_v27 = vsub.s32 2, %v106_v4 }
  0x4b   :  { %537 = vmatprep.subr.bf16.mxu0 %v706_v0  ;;  %p681_p0 = pnand %p680_p13, %p674_p10 }
  0x4c   :  { %560 = vmatpush3.bf16.msra.mxu1 %v559_v36  ;;  %v258_v28 = vrot.slane %v56_v6, %v257_v27  ;;  %v340_v36 = vsub.s32 4, %v106_v4 }
  0x4d   :  { %561 = vmatprep.subr.bf16.mxu1 %v706_v0 }
  0x4e   :  { %539 = vmatpush3.bf16.msra.mxu0 %v538_v33  ;;  %v341_v38 = vrot.slane %v56_v6, %v340_v36 }
  0x4f   :  { %540 = vmatprep.subr.bf16.mxu0 %v706_v0 }
  0x50   :  { %563 = vmatpush3.bf16.msra.mxu1 %v562_v44 }
  0x51   :  { %564 = vmatprep.subr.bf16.mxu1 %v706_v0 }
  0x52   :  { %542 = vmatpush3.bf16.msra.mxu0 %v541_v37 }
  0x53   :  { %543 = vmatprep.subr.bf16.mxu0 %v706_v0 }
  0x54   :  { %566 = vmatpush3.bf16.msra.mxu1 %v565_v47 }
  0x55   :  { %567 = vmatprep.subr.bf16.mxu1 %v706_v0 }
  0x56   :  { %545 = vmatpush3.bf16.msra.mxu0 %v544_v40 }
  0x57   :  { %570 = vmatprep.subr.bf16.mxu0 %v706_v0 }
  0x58   :  { %569 = vmatpush3.bf16.msra.mxu1 %v568_v50 }
  0x59   :  { %450 = vmatmul.mubr.f32.vlgmr.msra.gmra.mrb[0].mxu0 %v55_v41  ;;  %v346_v41 = vand.u32 127, %v105_v3 }
  0x5a   :  { %519 = vmatprep.mubr.msk.f32.mxu0 %vm707_vm0, %v708_v1  ;;  %572 = vmatpush3.bf16.msra.mxu0 %v571_v54  ;;  %v98_v1 = vld [vmem:[#allocation7 + $0x148] sm:$0xff] }
  0x5b   :  { %573 = vmatprep.subr.bf16.mxu0 %v706_v0  ;;  %v583_v2 = vpack.c.bf16 %v98_v1, %v97_v63  ;;  %vm347_vm1 = vcmp.eq.s32.totalorder %v346_v41, 8 }
  0x5e   :  { %575 = vmatpush3.bf16.msra.mxu0 %v574_v56 }
  0x5f   :  { %576 = vmatprep.subr.bf16.mxu0 %v706_v0 }
  0x62   :  { %578 = vmatpush3.bf16.msra.mxu0 %v577_v59 }
  0x63   :  { %579 = vmatprep.subr.bf16.mxu0 %v706_v0 }
  0x66   :  { %581 = vmatpush3.bf16.msra.mxu0 %v580_v62 }
  0x67   :  { %582 = vmatprep.subr.bf16.mxu0 %v706_v0 }
  0x6a   :  { %584 = vmatpush3.bf16.msra.mxu0 %v583_v2 }
  0x6b   :  { %585 = vmatprep.subr.bf16.mxu0 %v706_v0 }
  0x6e   :  { %587 = vmatpush3.bf16.msra.mxu0 %v586_v14 }
  0x6f   :  { %588 = vmatprep.subr.bf16.mxu0 %v706_v0 }
  0x72   :  { %590 = vmatpush3.bf16.msra.mxu0 %v589_v17 }
  0x73   :  { %591 = vmatprep.subr.bf16.mxu0 %v706_v0 }
  0x76   :  { %593 = vmatpush3.bf16.msra.mxu0 %v592_v20 }
 0x12c   :  { %v175_v8 = vpop.f32.mrb[0].mxu0 }
 0x12d   :  { %v176_v9 = vadd.f32 %v175_v8, %v108_v7  ;;  %v451_v10 = vpop.f32.mrb[1].mxu0 }
 0x12f   :  { %603 = vtanh.f32 %v176_v9 }
 0x139   :  { %v604_v11 = vpop.eup %603 }
 0x13a   :  { %485 = vmatmul.mubr.f32.vlgmr.msra.gmra.mrb[0].mxu1 %v604_v11 }
 0x20d   :  { %v250_v23 = vpop.f32.mrb[0].mxu1 }
 0x20e   :  { %v251_v24 = vadd.f32 %v250_v23, %v183_v22  ;;  %v486_v25 = vpop.f32.mrb[1].mxu1 }
 0x210   :  { %605 = vtanh.f32 %v251_v24 }
 0x21a   :  { %v606_v26 = vpop.eup %605 }
 0x21b   :  { %520 = vmatmul.mubr.f32.vlgmr.msra.gmra.mrb[2].mxu0 %v606_v26 }
 0x2ee   :  { %v325_v30 = vpop.f32.mrb[2].mxu0 }
 0x2ef   :  { %v326_v32 = vadd.f32 %v325_v30, %v258_v28  ;;  %v521_v33 = vpop.f32.mrb[3].mxu0 }
 0x2f1   :  { %v330_v35 = vsub.f32 %v329_v31, %v326_v32 }
 0x2f3   :  { %v335_v0 = vmul.f32 %v334_v34, %v330_v35 }
 0x2f5   :  { %v336_v37 = vmul.f32 %v335_v0, %v335_v0 }
 0x2f7   :  { %v337_v39 = vmul.f32 -0.5, %v336_v37 }
 0x2f9   :  { %v342_v40 = vadd.f32 %v341_v38, %v337_v39 }
 0x2fb   :  { %343 = vadd.xlane.f32.xlu0 %v342_v40 }
 0x388   :  { %v344_v42 = vpop.xlane.xlu0 %343 }
 0x389   :  { %v348_v43 = vsel %vm347_vm1, %v344_v42, %v326_v32 }
 0x38a   :  { %349 = vst [vmem:[#allocation8] sm:$0xff] %v348_v43 }
 0x38b   :  { %684 = shalt.err (!%p681_p0)
}
 0x38c   :  { %s685_s30 = scalar_lea.hbm %s820_s4, 128 }
 0x38d   :  { %p686_p1 = scmp.ne.s32.totalorder %s820_s4, %s685_s30  ;;  %p689_p2 = scmp.lt.u32.totalorder %s685_s30, %s820_s4 }
 0x38f   :  { %p691_p3 = pnand %p689_p2, %p686_p1 }
 0x391   :  { %694 = shalt.err (!%p691_p3)
}
 0x392   :  { %359 = dma.vmem_to_hbm [thread:$0]  %s357_s26, 128, %s820_s4, [#allocation4]  }
 0x393   :  { %699 = dma.done.wait [#allocation4], 128  }
 0x394   :  { %700 = vsyncadd [#allocation4], 4294967168 }
 0x395   :  { %363 = vsyncpa [#allocation3], 1 }
 0x396   :  { %364 = vsyncpa [#allocation6], 1 }
 0x397   :  { %365 = vsyncpa [#allocation4], 1 }

</bundles_post_ra>
